<compile_context>
chip_gen: v5e
topology: v5e:2x2
jax: 0.10.0
libtpu: 0.0.40
codegen_flags: <defaults>
</compile_context>

<pallas_src>
import functools

import jax
import jax.numpy as jnp
from jax.experimental import pallas as pl
from jax.experimental.pallas import tpu as pltpu


_INV_SQRT2 = 0.7071067811865476
_MiB = 1024 * 1024


# --------------------------------------------------------------------------- kernel
def _ffn_kernel(x_ref, w1_ref, b1_ref, w2_ref, b2_ref, o_ref, acc_ref):
    # grid = (token_tiles [parallel], hidden_tiles [arbitrary/reduction])
    j = pl.program_id(1)
    nj = pl.num_programs(1)

    @pl.when(j == 0)
    def _init():
        # fc2 bias hoisted into the accumulator (added exactly once per token tile).
        acc_ref[...] = jnp.broadcast_to(
            b2_ref[...].astype(jnp.float32), acc_ref.shape
        )

    cdt = w1_ref.dtype
    # x arrives in its native dtype; cast under the matmul (free VPU filler).
    x = x_ref[...].astype(cdt)

    # fc1 hidden-slice on the MXU, f32 accumulation; bias + exact erf GELU in f32.
    h = jnp.dot(x, w1_ref[...], preferred_element_type=jnp.float32)
    h = h + b1_ref[...]
    h = 0.5 * h * (1.0 + jax.lax.erf(h * jnp.float32(_INV_SQRT2)))

    # dropout (eval mode) == identity
    # TODO(synk): training-mode dropout (PRNG mask) not emitted.

    # fc2 partial contribution for this hidden tile.
    partial = jnp.dot(h.astype(cdt), w2_ref[...], preferred_element_type=jnp.float32)

    @pl.when(j < nj - 1)
    def _accum():
        acc_ref[...] += partial

    @pl.when(j == nj - 1)
    def _finalize():
        # Fuse the final reduction step with the store (skip one acc write + read).
        o_ref[...] = (acc_ref[...] + partial).astype(o_ref.dtype)

    # TODO(synk): for very large out_dim (>=8K) on v7x, add an output-column grid axis
    # so the f32 accumulator is (tm, tn) instead of (tm, out_p); unnecessary here.


# --------------------------------------------------------------------------- helpers
def _round_up(n, m):
    return ((n + m - 1) // m) * m


def _sublane_multiple(dtype):
    # packed-sublane granularity: f32 -> 8, bf16 -> 16, int8/fp8 -> 32
    return max(8, 32 // jnp.dtype(dtype).itemsize)


def _pick_divisor_tile(total, want, step):
    t = max(step, (min(want, total) // step) * step)
    while total % t:
        t -= step
    return t


@functools.lru_cache(maxsize=None)
def _chip_config():
    """Best-effort TPU generation detection -> tiling / VMEM defaults."""
    kind = ""
    try:
        kind = jax.devices()[0].device_kind.lower()
    except Exception:
        pass
    vmem_cap = None
    try:
        vmem_cap = int(pltpu.get_tpu_info().vmem_capacity_bytes)
    except Exception:
        pass

    small_vmem = vmem_cap is not None and vmem_cap <= 64 * _MiB
    if "v7" in kind or small_vmem:
        # v7x: 64 MiB VMEM/TC, ~3.2 TB/s HBM (~310 flop/B balance), 2 TCs/chip.
        return dict(align=256, tm=512, th=512,
                    vmem_limit=52 * _MiB, vmem_budget=44 * _MiB, two_cores=True)
    if "v5" in kind:
        # v5e: 128x128 MXU, ~0.8 TB/s HBM (~250 flop/B balance): tm=256 is MXU-bound.
        return dict(align=128, tm=256, th=512,
                    vmem_limit=64 * _MiB, vmem_budget=56 * _MiB, two_cores=False)
    if "v6" in kind:
        # v6e: 256x256 MXU, ~1.4 TB/s HBM (~650 flop/B balance): big token tiles.
        return dict(align=256, tm=1024, th=512,
                    vmem_limit=112 * _MiB, vmem_budget=96 * _MiB, two_cores=False)
    # Unknown generation: conservative tiles and a modest VMEM request.
    return dict(align=128, tm=256, th=512,
                vmem_limit=48 * _MiB, vmem_budget=40 * _MiB, two_cores=False)


# --------------------------------------------------------------------------- wrappers
def prepare_params(w1, b1, w2, b2, *, compute_dtype=jnp.bfloat16, align=None):
    """Pad feature dims to the MXU alignment and cast weights to the compute dtype.

    Call this ONCE (init time); feed_forward_prepared then streams these directly,
    so no per-call HBM pad/cast pass over the weight matrices.
    """
    if align is None:
        align = _chip_config()["align"]
    dim, hidden = w1.shape
    out_dim = w2.shape[1]
    dim_p, hid_p, out_p = (_round_up(d, align) for d in (dim, hidden, out_dim))
    cdt = jnp.dtype(compute_dtype)
    w1p = jnp.pad(w1, ((0, dim_p - dim), (0, hid_p - hidden))).astype(cdt)
    w2p = jnp.pad(w2, ((0, hid_p - hidden), (0, out_p - out_dim))).astype(cdt)
    b1p = jnp.pad(b1, (0, hid_p - hidden)).astype(jnp.float32).reshape(1, hid_p)
    b2p = jnp.pad(b2, (0, out_p - out_dim)).astype(jnp.float32).reshape(1, out_p)
    return (w1p, b1p, w2p, b2p), (dim, hidden, out_dim)


@functools.partial(jax.jit, static_argnames=("out_dim", "tm", "th"))
def feed_forward_prepared(x, w1p, b1p, w2p, b2p, *, out_dim, tm=None, th=None):
    """x: (..., dim) -> (..., out_dim). Weights already padded/cast by prepare_params."""
    cfg = _chip_config()
    *lead, dim = x.shape
    M = 1
    for d in lead:
        M *= d
    dim_p, hid_p = w1p.shape
    out_p = w2p.shape[1]
    out_dtype = x.dtype

    x_bytes = jnp.dtype(x.dtype).itemsize
    cdt_bytes = jnp.dtype(w1p.dtype).itemsize
    sub = max(_sublane_multiple(w1p.dtype), _sublane_multiple(out_dtype))

    # ---- tile selection ----------------------------------------------------
    align = cfg["align"] if hid_p % cfg["align"] == 0 else 128
    th_eff = _pick_divisor_tile(hid_p, th if th is not None else cfg["th"], align)

    tm_eff = tm if tm is not None else cfg["tm"]
    tm_eff = min(_round_up(tm_eff, sub), _round_up(M, sub))
    if cfg["two_cores"] and M >= 2 * sub:
        # v7x has 2 TensorCores: keep >= 2 token tiles so neither core idles.
        tm_eff = min(tm_eff, _round_up(-(-M // 2), sub))

    def vmem_est(tm_, th_):
        return (2 * tm_ * dim_p * x_bytes       # x tile (double-buffered, input dtype)
                + 2 * dim_p * th_ * cdt_bytes   # w1 hidden tile
                + 2 * th_ * out_p * cdt_bytes   # w2 hidden tile
                + 2 * (th_ + out_p) * 4         # bias tiles
                + tm_ * out_p * 4               # f32 accumulator scratch
                + 2 * tm_ * out_p * x_bytes)    # output tile

    # Fit the VMEM budget: shrink the reduction chunk first, then the token tile.
    while vmem_est(tm_eff, th_eff) > cfg["vmem_budget"] and th_eff > align:
        th_eff = _pick_divisor_tile(hid_p, th_eff - align, align)
    while vmem_est(tm_eff, th_eff) > cfg["vmem_budget"] and tm_eff > sub:
        tm_eff = max(sub, _round_up(tm_eff // 2, sub))

    M_pad = _round_up(M, tm_eff)

    x2d = x.reshape(M, dim)
    if M_pad != M or dim_p != dim:
        x2d = jnp.pad(x2d, ((0, M_pad - M), (0, dim_p - dim)))

    grid = (M_pad // tm_eff, hid_p // th_eff)

    out2d = pl.pallas_call(
        _ffn_kernel,
        out_shape=jax.ShapeDtypeStruct((M_pad, out_p), out_dtype),
        grid_spec=pltpu.PrefetchScalarGridSpec(
            num_scalar_prefetch=0,
            grid=grid,
            in_specs=[
                pl.BlockSpec((tm_eff, dim_p), lambda i, j: (i, 0)),   # x token tile
                pl.BlockSpec((dim_p, th_eff), lambda i, j: (0, j)),   # w1 hidden tile
                pl.BlockSpec((1, th_eff), lambda i, j: (0, j)),       # b1 hidden tile
                pl.BlockSpec((th_eff, out_p), lambda i, j: (j, 0)),   # w2 hidden tile
                pl.BlockSpec((1, out_p), lambda i, j: (0, 0)),        # b2
            ],
            out_specs=pl.BlockSpec((tm_eff, out_p), lambda i, j: (i, 0)),
            scratch_shapes=[pltpu.VMEM((tm_eff, out_p), jnp.float32)],
        ),
        compiler_params=pltpu.CompilerParams(
            dimension_semantics=("parallel", "arbitrary"),
            vmem_limit_bytes=cfg["vmem_limit"],
        ),
    )(x2d, w1p, b1p, w2p, b2p)

    return out2d[:M, :out_dim].reshape(*lead, out_dim)


def feed_forward(x, w1, b1, w2, b2, *, compute_dtype=jnp.bfloat16, tm=None, th=None):
    """Convenience one-shot wrapper (re-pads weights every call).

    For hot paths, call prepare_params once and reuse feed_forward_prepared.
    """
    (w1p, b1p, w2p, b2p), (_, _, out_dim) = prepare_params(
        w1, b1, w2, b2, compute_dtype=compute_dtype
    )
    return feed_forward_prepared(x, w1p, b1p, w2p, b2p, out_dim=out_dim, tm=tm, th=th)


# --------------------------------------------------------------------------- test
def init_params(key, dim, hidden_dim, out_dim):
    """Deterministic init mimicking nn.Linear defaults (uniform +/- 1/sqrt(fan_in))."""
    k1, k2, k3, k4 = jax.random.split(key, 4)
    lim1 = 1.0 / jnp.sqrt(dim)
    lim2 = 1.0 / jnp.sqrt(hidden_dim)
    # stored as (in, out) so the kernel computes x @ W
    w1 = jax.random.uniform(k1, (dim, hidden_dim), jnp.float32, -lim1, lim1)
    b1 = jax.random.uniform(k2, (hidden_dim,), jnp.float32, -lim1, lim1)
    w2 = jax.random.uniform(k3, (hidden_dim, out_dim), jnp.float32, -lim2, lim2)
    b2 = jax.random.uniform(k4, (out_dim,), jnp.float32, -lim2, lim2)
    return w1, b1, w2, b2


def _ref_forward(x, w1, b1, w2, b2):
    """Plain-JAX reference matching the PyTorch module in eval mode (f32)."""
    h = x @ w1 + b1
    h = 0.5 * h * (1.0 + jax.lax.erf(h * jnp.float32(_INV_SQRT2)))
    return h @ w2 + b2


if __name__ == "__main__":
    # Module config: FeedForward(dim=32, hidden_dim=64, dropout=0.0)
    dim, hidden_dim = 32, 64
    out_dim = dim
    batch, seq = 2, 8

    key = jax.random.PRNGKey(0)
    kx, kp = jax.random.split(key)
    x = jax.random.normal(kx, (batch, seq, dim), jnp.float32)
    w1, b1, w2, b2 = init_params(kp, dim, hidden_dim, out_dim)

    y_ref = _ref_forward(x, w1, b1, w2, b2)

    # 1) f32 MXU path: tight check against the module semantics.
    p32, (_, _, od) = prepare_params(w1, b1, w2, b2, compute_dtype=jnp.float32)
    y32 = feed_forward_prepared(x, *p32, out_dim=od)
    y32 = jax.block_until_ready(y32)
    assert y32.shape == (batch, seq, out_dim)
    assert jnp.allclose(y32, y_ref, atol=1e-5, rtol=1e-5), "f32 path mismatch"

    # 2) default bf16-MXU / f32-accumulate path: loose check (bf16 weight tolerance).
    pbf, (_, _, od) = prepare_params(w1, b1, w2, b2, compute_dtype=jnp.bfloat16)
    ybf = feed_forward_prepared(x, *pbf, out_dim=od)
    ybf = jax.block_until_ready(ybf)
    assert ybf.shape == (batch, seq, out_dim)
    assert jnp.allclose(ybf, y_ref, atol=3e-2, rtol=3e-2), "bf16 path mismatch"

    print("KERNEL_OK")
</pallas_src>

<mosaic_0001>
module attributes {stable_mosaic.version = 11 : i64} {
  func.func @_ffn_kernel(%arg0: i32, %arg1: i32, %arg2: memref<16x128xf32, #tpu.memory_space<vmem>>, %arg3: memref<128x128xf32, #tpu.memory_space<vmem>>, %arg4: memref<1x128xf32, #tpu.memory_space<vmem>>, %arg5: memref<128x128xf32, #tpu.memory_space<vmem>>, %arg6: memref<1x128xf32, #tpu.memory_space<vmem>>, %arg7: memref<16x128xf32, #tpu.memory_space<vmem>>, %arg8: memref<16x128xf32, #tpu.memory_space<vmem>>) attributes {dimension_semantics = [#tpu.dimension_semantics<parallel>, #tpu.dimension_semantics<arbitrary>], iteration_bounds = array<i64: 1, 1>, scalar_prefetch = 0 : i64, scratch_operands = 1 : i64, tpu.core_type = #tpu.core_type<tc>, window_params = [{transform_indices = @transform_0, window_bounds = array<i64: 16, 128>}, {transform_indices = @transform_1, window_bounds = array<i64: 128, 128>}, {transform_indices = @transform_2, window_bounds = array<i64: 1, 128>}, {transform_indices = @transform_3, window_bounds = array<i64: 128, 128>}, {pipeline_mode = #tpu.pipeline_mode<synchronous>, transform_indices = @transform_4, window_bounds = array<i64: 1, 128>}, {transform_indices = @transform_5, window_bounds = array<i64: 16, 128>}]} {
    %c0_i32 = arith.constant 0 : i32
    %0 = arith.cmpi eq, %arg1, %c0_i32 : i32
    %1 = arith.extui %0 : i1 to i32
    %c0_i32_0 = arith.constant 0 : i32
    %2 = arith.cmpi ne, %1, %c0_i32_0 : i32
    scf.if %2 {
      %c0_16 = arith.constant 0 : index
      %c0_17 = arith.constant 0 : index
      %25 = vector.load %arg6[%c0_16, %c0_17] : memref<1x128xf32, #tpu.memory_space<vmem>>, vector<1x128xf32>
      %26 = vector.shape_cast %25 : vector<1x128xf32> to vector<1x128xf32>
      %27 = vector.broadcast %26 : vector<1x128xf32> to vector<16x128xf32>
      %c0_18 = arith.constant 0 : index
      %c0_19 = arith.constant 0 : index
      %28 = vector.load %arg8[%c0_18, %c0_19] : memref<16x128xf32, #tpu.memory_space<vmem>>, vector<16x128xf32>
      tpu.vector_store %arg8[%c0_18, %c0_19], %27 {strides = array<i32>} : memref<16x128xf32, #tpu.memory_space<vmem>>, vector<16x128xf32>,
    } else {
    }
    %c0 = arith.constant 0 : index
    %c0_1 = arith.constant 0 : index
    %3 = vector.load %arg2[%c0, %c0_1] : memref<16x128xf32, #tpu.memory_space<vmem>>, vector<16x128xf32>
    %c0_2 = arith.constant 0 : index
    %c0_3 = arith.constant 0 : index
    %4 = vector.load %arg3[%c0_2, %c0_3] : memref<128x128xf32, #tpu.memory_space<vmem>>, vector<128x128xf32>
    %cst = arith.constant dense<0.000000e+00> : vector<16x128xf32>
    %5 = tpu.matmul %3, %4, %cst {dimension_numbers = #tpu.dot_dimension_numbers<[1], [0], [0], [1], [0, 0, 1, 1], [], []>} : vector<16x128xf32>, vector<128x128xf32>, vector<16x128xf32> -> vector<16x128xf32>
    %c0_4 = arith.constant 0 : index
    %c0_5 = arith.constant 0 : index
    %6 = vector.load %arg4[%c0_4, %c0_5] : memref<1x128xf32, #tpu.memory_space<vmem>>, vector<1x128xf32>
    %7 = vector.broadcast %6 : vector<1x128xf32> to vector<16x128xf32>
    %8 = arith.addf %5, %7 : vector<16x128xf32>
    %cst_6 = arith.constant 5.000000e-01 : f32
    %9 = vector.broadcast %cst_6 : f32 to vector<16x128xf32>
    %10 = arith.mulf %9, %8 : vector<16x128xf32>
    %cst_7 = arith.constant 0.707106769 : f32
    %11 = vector.broadcast %cst_7 : f32 to vector<16x128xf32>
    %12 = arith.mulf %8, %11 : vector<16x128xf32>
    %13 = math.erf %12 : vector<16x128xf32>
    %cst_8 = arith.constant 1.000000e+00 : f32
    %14 = vector.broadcast %cst_8 : f32 to vector<16x128xf32>
    %15 = arith.addf %14, %13 : vector<16x128xf32>
    %16 = arith.mulf %10, %15 : vector<16x128xf32>
    %c0_9 = arith.constant 0 : index
    %c0_10 = arith.constant 0 : index
    %17 = vector.load %arg5[%c0_9, %c0_10] : memref<128x128xf32, #tpu.memory_space<vmem>>, vector<128x128xf32>
    %cst_11 = arith.constant dense<0.000000e+00> : vector<16x128xf32>
    %18 = tpu.matmul %16, %17, %cst_11 {dimension_numbers = #tpu.dot_dimension_numbers<[1], [0], [0], [1], [0, 0, 1, 1], [], []>} : vector<16x128xf32>, vector<128x128xf32>, vector<16x128xf32> -> vector<16x128xf32>
    %c0_i32_12 = arith.constant 0 : i32
    %19 = arith.cmpi slt, %arg1, %c0_i32_12 : i32
    %20 = arith.extui %19 : i1 to i32
    %c0_i32_13 = arith.constant 0 : i32
    %21 = arith.cmpi ne, %20, %c0_i32_13 : i32
    scf.if %21 {
      %c0_16 = arith.constant 0 : index
      %c0_17 = arith.constant 0 : index
      %25 = vector.load %arg8[%c0_16, %c0_17] : memref<16x128xf32, #tpu.memory_space<vmem>>, vector<16x128xf32>
      %26 = arith.addf %25, %18 : vector<16x128xf32>
      %c0_18 = arith.constant 0 : index
      %c0_19 = arith.constant 0 : index
      %27 = vector.load %arg8[%c0_18, %c0_19] : memref<16x128xf32, #tpu.memory_space<vmem>>, vector<16x128xf32>
      tpu.vector_store %arg8[%c0_18, %c0_19], %26 {strides = array<i32>} : memref<16x128xf32, #tpu.memory_space<vmem>>, vector<16x128xf32>,
    } else {
    }
    %c0_i32_14 = arith.constant 0 : i32
    %22 = arith.cmpi eq, %arg1, %c0_i32_14 : i32
    %23 = arith.extui %22 : i1 to i32
    %c0_i32_15 = arith.constant 0 : i32
    %24 = arith.cmpi ne, %23, %c0_i32_15 : i32
    scf.if %24 {
      %c0_16 = arith.constant 0 : index
      %c0_17 = arith.constant 0 : index
      %25 = vector.load %arg8[%c0_16, %c0_17] : memref<16x128xf32, #tpu.memory_space<vmem>>, vector<16x128xf32>
      %26 = arith.addf %25, %18 : vector<16x128xf32>
      %c0_18 = arith.constant 0 : index
      %c0_19 = arith.constant 0 : index
      %27 = vector.load %arg7[%c0_18, %c0_19] : memref<16x128xf32, #tpu.memory_space<vmem>>, vector<16x128xf32>
      tpu.vector_store %arg7[%c0_18, %c0_19], %26 {strides = array<i32>} : memref<16x128xf32, #tpu.memory_space<vmem>>, vector<16x128xf32>,
    } else {
    }
    return
  }
  func.func @transform_0(%arg0: i32, %arg1: i32) -> (i32, i32) {
    %c0_i32 = arith.constant 0 : i32
    %c0_i32_0 = arith.constant 0 : i32
    return %arg0, %c0_i32 : i32, i32
  }
  func.func @transform_1(%arg0: i32, %arg1: i32) -> (i32, i32) {
    %c0_i32 = arith.constant 0 : i32
    %c0_i32_0 = arith.constant 0 : i32
    return %c0_i32, %arg1 : i32, i32
  }
  func.func @transform_2(%arg0: i32, %arg1: i32) -> (i32, i32) {
    %c0_i32 = arith.constant 0 : i32
    %c0_i32_0 = arith.constant 0 : i32
    return %c0_i32, %arg1 : i32, i32
  }
  func.func @transform_3(%arg0: i32, %arg1: i32) -> (i32, i32) {
    %c0_i32 = arith.constant 0 : i32
    %c0_i32_0 = arith.constant 0 : i32
    return %arg1, %c0_i32 : i32, i32
  }
  func.func @transform_4(%arg0: i32, %arg1: i32) -> (i32, i32) {
    %c0_i32 = arith.constant 0 : i32
    %c0_i32_0 = arith.constant 0 : i32
    %c0_i32_1 = arith.constant 0 : i32
    return %c0_i32, %c0_i32_0 : i32, i32
  }
  func.func @transform_5(%arg0: i32, %arg1: i32) -> (i32, i32) {
    %c0_i32 = arith.constant 0 : i32
    %c0_i32_0 = arith.constant 0 : i32
    return %arg0, %c0_i32 : i32, i32
  }
}

</mosaic_0001>

<bundles_post_ra>
// kernel: feed_forward_prepared.1
= control target key start
LH: loop header
LB: loop body
LE: loop exit
PB: predicated region body
PF: predicated region fallthrough
CT: control target
= control target key end

     0   :  { %10 = vsyncpa [#allocation4], 0  ;;  %s443_s0 = inlined_call_operand.vmem [shape: f32[16,128], index: 0, kind: input, shape index: {}]   ;;  %s444_s1 = inlined_call_operand.hbm [shape: f32[128,128], index: 1, kind: input, shape index: {}]   ;;  %s445_s2 = inlined_call_operand.vmem [shape: f32[1,128], index: 2, kind: input, shape index: {}]   ;;  %s446_s3 = inlined_call_operand.hbm [shape: f32[128,128], index: 3, kind: input, shape index: {}]   ;;  %s447_s4 = inlined_call_operand.vmem [shape: f32[1,128], index: 4, kind: input, shape index: {}]   ;;  %s448_s5 = inlined_call_operand.vmem [shape: f32[16,128], index: 5, kind: output, shape index: {}]  }
   0x1   :  { %s18_s20 = sshll.u32 %s444_s1, 4  ;;  %s19_s20 = int_to_ptr.hbm [resolvable:$true] %s18_s20 }
   0x2   :  { %11 = vsyncpa [#allocation6], 0  ;;  %s355_s21 = smov [#allocation3]   ;;  %s33_s25 = sshll.u32 %s446_s3, 4  ;;  %s34_s25 = int_to_ptr.hbm [resolvable:$true] %s33_s25 }
   0x3   :  { %s20_s22 = sshll.u32 %s355_s21, 4  ;;  %s356_s26 = smov 128   ;;  %s21_s22 = int_to_ptr.vmem [resolvable:$true] %s20_s22 }
   0x4   :  { %s357_s27 = smov 8   ;;  %s358_s28 = smov [#allocation5]  }
   0x5   :  { %26 = dma.hbm_to_vmem [thread:$0]  %s19_s20, 2048, %s21_s22, [#allocation4], %s356_s26, %s356_s26, %s357_s27  }
   0x6   :  { %s35_s29 = sshll.u32 %s358_s28, 4  ;;  %s36_s29 = int_to_ptr.vmem [resolvable:$true] %s35_s29 }
   0x7   :  { %41 = dma.hbm_to_vmem [thread:$0]  %s34_s25, 2048, %s36_s29, [#allocation6], %s356_s26, %s356_s26, %s357_s27  }
   0x8   :  { %351 = dma.done.wait [#allocation4], 2048  }
   0x9   :  { %352 = vsyncadd [#allocation4], 4294965248 }
   0xa   :  { %353 = dma.done.wait [#allocation6], 2048  }
   0xb   :  { %354 = vsyncadd [#allocation6], 4294965248  ;;  %v79_v0 = vld [vmem:[#allocation3 + $0x78] sm:$0xff]  ;;  %v78_v1 = vld [vmem:[#allocation3 + $0x70] sm:$0xff] }
   0xc   :  { %84 = vmatpush.msra.mxu0 %v79_v0  ;;  %261 = vmatpush.msra.mxu2 %v79_v0  ;;  %v77_v2 = vld [vmem:[#allocation3 + $0x68] sm:$0xff]  ;;  %v76_v3 = vld [vmem:[#allocation3 + $0x60] sm:$0xff]  ;;  %v75_v4 = vld [vmem:[#allocation3 + $0x58] sm:$0xff] }
   0xd   :  { %v74_v5 = vld [vmem:[#allocation3 + $0x50] sm:$0xff]  ;;  %v73_v6 = vld [vmem:[#allocation3 + $0x48] sm:$0xff]  ;;  %v72_v7 = vld [vmem:[#allocation3 + $0x40] sm:$0xff] }
   0xe   :  { %85 = vmatpush.msra.mxu0 %v78_v1  ;;  %262 = vmatpush.msra.mxu2 %v78_v1  ;;  %v71_v8 = vld [vmem:[#allocation3 + $0x38] sm:$0xff]  ;;  %v70_v9 = vld [vmem:[#allocation3 + $0x30] sm:$0xff]  ;;  %v69_v10 = vld [vmem:[#allocation3 + $0x28] sm:$0xff] }
   0xf   :  { %v68_v11 = vld [vmem:[#allocation3 + $0x20] sm:$0xff]  ;;  %v67_v12 = vld [vmem:[#allocation3 + $0x18] sm:$0xff]  ;;  %v66_v13 = vld [vmem:[#allocation3 + $0x10] sm:$0xff] }
  0x10   :  { %86 = vmatpush.msra.mxu0 %v77_v2  ;;  %263 = vmatpush.msra.mxu2 %v77_v2  ;;  %v65_v14 = vld [vmem:[#allocation3 + $0x8] sm:$0xff]  ;;  %v64_v15 = vld [vmem:[#allocation3] sm:$0xff]  ;;  %v210_v18 = vld [vmem:[#allocation5 + $0x78] sm:$0xff] }
  0x11   :  { %v62_v16 = vld [vmem:[%s443_s0] sm:$0xff]  ;;  %v63_v17 = vld [vmem:[%s443_s0 + $0x8] sm:$0xff]  ;;  %211 = vmatpush.msra.mxu1 %v210_v18  ;;  %277 = vmatpush.msra.mxu3 %v210_v18  ;;  %v209_v19 = vld [vmem:[#allocation5 + $0x70] sm:$0xff] }
  0x12   :  { %87 = vmatpush.msra.mxu0 %v76_v3  ;;  %264 = vmatpush.msra.mxu2 %v76_v3  ;;  %v208_v20 = vld [vmem:[#allocation5 + $0x68] sm:$0xff]  ;;  %v207_v21 = vld [vmem:[#allocation5 + $0x60] sm:$0xff]  ;;  %v206_v23 = vld [vmem:[#allocation5 + $0x58] sm:$0xff] }
  0x13   :  { %212 = vmatpush.msra.mxu1 %v209_v19  ;;  %278 = vmatpush.msra.mxu3 %v209_v19  ;;  %v297_v22 = vld [vmem:[%s445_s2] ss:$0 sm:$0xff]  ;;  %v205_v25 = vld [vmem:[#allocation5 + $0x50] sm:$0xff]  ;;  %v204_v27 = vld [vmem:[#allocation5 + $0x48] sm:$0xff] }
  0x14   :  { %88 = vmatpush.msra.mxu0 %v75_v4  ;;  %265 = vmatpush.msra.mxu2 %v75_v4  ;;  %v203_v29 = vld [vmem:[#allocation5 + $0x40] sm:$0xff]  ;;  %v202_v30 = vld [vmem:[#allocation5 + $0x38] sm:$0xff]  ;;  %v201_v33 = vld [vmem:[#allocation5 + $0x30] sm:$0xff] }
  0x15   :  { %213 = vmatpush.msra.mxu1 %v208_v20  ;;  %279 = vmatpush.msra.mxu3 %v208_v20  ;;  %v200_v36 = vld [vmem:[#allocation5 + $0x28] sm:$0xff]  ;;  %v199_v39 = vld [vmem:[#allocation5 + $0x20] sm:$0xff]  ;;  %v198_v43 = vld [vmem:[#allocation5 + $0x18] sm:$0xff] }
  0x16   :  { %89 = vmatpush.msra.mxu0 %v74_v5  ;;  %266 = vmatpush.msra.mxu2 %v74_v5  ;;  %v197_v47 = vld [vmem:[#allocation5 + $0x10] sm:$0xff]  ;;  %v196_v52 = vld [vmem:[#allocation5 + $0x8] sm:$0xff]  ;;  %v195_v56 = vld [vmem:[#allocation5] sm:$0xff] }
  0x17   :  { %214 = vmatpush.msra.mxu1 %v207_v21  ;;  %280 = vmatpush.msra.mxu3 %v207_v21 }
  0x18   :  { %90 = vmatpush.msra.mxu0 %v73_v6  ;;  %267 = vmatpush.msra.mxu2 %v73_v6 }
  0x19   :  { %215 = vmatpush.msra.mxu1 %v206_v23  ;;  %281 = vmatpush.msra.mxu3 %v206_v23 }
  0x1a   :  { %91 = vmatpush.msra.mxu0 %v72_v7  ;;  %268 = vmatpush.msra.mxu2 %v72_v7 }
  0x1b   :  { %216 = vmatpush.msra.mxu1 %v205_v25  ;;  %282 = vmatpush.msra.mxu3 %v205_v25 }
  0x1c   :  { %92 = vmatpush.msra.mxu0 %v71_v8  ;;  %269 = vmatpush.msra.mxu2 %v71_v8 }
  0x1d   :  { %217 = vmatpush.msra.mxu1 %v204_v27  ;;  %283 = vmatpush.msra.mxu3 %v204_v27 }
  0x1e   :  { %93 = vmatpush.msra.mxu0 %v70_v9  ;;  %270 = vmatpush.msra.mxu2 %v70_v9 }
  0x1f   :  { %218 = vmatpush.msra.mxu1 %v203_v29  ;;  %284 = vmatpush.msra.mxu3 %v203_v29 }
  0x20   :  { %94 = vmatpush.msra.mxu0 %v69_v10  ;;  %271 = vmatpush.msra.mxu2 %v69_v10 }
  0x21   :  { %219 = vmatpush.msra.mxu1 %v202_v30  ;;  %285 = vmatpush.msra.mxu3 %v202_v30 }
  0x22   :  { %95 = vmatpush.msra.mxu0 %v68_v11  ;;  %272 = vmatpush.msra.mxu2 %v68_v11 }
  0x23   :  { %220 = vmatpush.msra.mxu1 %v201_v33  ;;  %286 = vmatpush.msra.mxu3 %v201_v33 }
  0x24   :  { %96 = vmatpush.msra.mxu0 %v67_v12  ;;  %273 = vmatpush.msra.mxu2 %v67_v12 }
  0x25   :  { %221 = vmatpush.msra.mxu1 %v200_v36  ;;  %287 = vmatpush.msra.mxu3 %v200_v36 }
  0x26   :  { %97 = vmatpush.msra.mxu0 %v66_v13  ;;  %274 = vmatpush.msra.mxu2 %v66_v13 }
  0x27   :  { %222 = vmatpush.msra.mxu1 %v199_v39  ;;  %288 = vmatpush.msra.mxu3 %v199_v39 }
  0x28   :  { %98 = vmatpush.msra.mxu0 %v65_v14  ;;  %275 = vmatpush.msra.mxu2 %v65_v14 }
  0x29   :  { %223 = vmatpush.msra.mxu1 %v198_v43  ;;  %289 = vmatpush.msra.mxu3 %v198_v43 }
  0x2a   :  { %99 = vmatpush.msra.mxu0 %v64_v15  ;;  %276 = vmatpush.msra.mxu2 %v64_v15 }
  0x2b   :  { %100 = vmatmul.f32.vlgmr.msra.gmra.mxu0 %v62_v16  ;;  %103 = vmatmul.f32.vlgmr.msra.gmra.mxu2 %v63_v17 }
  0x2c   :  { %224 = vmatpush.msra.mxu1 %v197_v47  ;;  %290 = vmatpush.msra.mxu3 %v197_v47 }
  0x2e   :  { %225 = vmatpush.msra.mxu1 %v196_v52  ;;  %291 = vmatpush.msra.mxu3 %v196_v52 }
  0x30   :  { %226 = vmatpush.msra.mxu1 %v195_v56  ;;  %292 = vmatpush.msra.mxu3 %v195_v56  ;;  %v298_v56 = vld [vmem:[%s447_s4] ss:$0 sm:$0xff] }
  0xa8   :  { %v101_v24 = vpop.f32.mrf.mxu0 }
  0xa9   :  { %v404_v26 = vadd.f32 %v297_v22, %v101_v24 }
  0xab   :  { %v407_v28 = vmul.f32 0.70710677, %v404_v26  ;;  %v107_v47 = vmul.f32 0.5, %v404_v26 }
  0xad   :  { %v111_v31 = vmul.f32 %v407_v28, %v407_v28 }
  0xae   :  { %v104_v32 = vpop.f32.mrf.mxu2 }
  0xaf   :  { %v411_v34 = vmin.f32 %v111_v31, 16.0  ;;  %v413_v35 = vadd.f32 %v297_v22, %v104_v32 }
  0xb1   :  { %v113_v37 = vmul.f32 2.1237322e-06, %v411_v34  ;;  %v417_v38 = vmul.f32 0.70710677, %v413_v35  ;;  %v124_v40 = vmul.f32 3.8918573e-05, %v411_v34 }
  0xb3   :  { %v114_v41 = vadd.f32 0.00028619796, %v113_v37  ;;  %v151_v42 = vmul.f32 %v417_v38, %v417_v38  ;;  %v125_v44 = vadd.f32 0.001143296, %v124_v40 }
  0xb5   :  { %v115_v45 = vmul.f32 %v114_v41, %v411_v34  ;;  %v152_v46 = vmin.f32 %v151_v42, 16.0  ;;  %v126_v48 = vmul.f32 %v125_v44, %v411_v34 }
  0xb7   :  { %v153_v49 = vmul.f32 2.1237322e-06, %v152_v46  ;;  %v164_v50 = vmul.f32 3.8918573e-05, %v152_v46  ;;  %v116_v51 = vadd.f32 0.0036580483, %v115_v45 }
  0xb8   :  { %v127_v53 = vadd.f32 0.014752088, %v126_v48 }
  0xb9   :  { %v154_v54 = vadd.f32 0.00028619796, %v153_v49  ;;  %v165_v55 = vadd.f32 0.001143296, %v164_v50  ;;  %v117_v60 = vmul.f32 %v116_v51, %v411_v34 }
  0xba   :  { %v128_v57 = vmul.f32 %v127_v53, %v411_v34  ;;  %v108_v53 = vmul.f32 0.5, %v413_v35 }
  0xbb   :  { %v155_v58 = vmul.f32 %v154_v54, %v152_v46  ;;  %v166_v59 = vmul.f32 %v165_v55, %v152_v46  ;;  %v118_v2 = vadd.f32 0.05243302, %v117_v60 }
  0xbc   :  { %v129_v61 = vadd.f32 0.112945676, %v128_v57 }
  0xbd   :  { %v156_v62 = vadd.f32 0.0036580483, %v155_v58  ;;  %v167_v63 = vadd.f32 0.014752088, %v166_v59  ;;  %v119_v8 = vmul.f32 %v118_v2, %v411_v34 }
  0xbe   :  { %v130_v0 = vmul.f32 %v129_v61, %v411_v34 }
  0xbf   :  { %v168_v1 = vmul.f32 %v167_v63, %v152_v46  ;;  %v157_v4 = vmul.f32 %v156_v62, %v152_v46  ;;  %v120_v13 = vadd.f32 0.18741608, %v119_v8 }
  0xc0   :  { %v131_v3 = vadd.f32 0.4994258, %v130_v0 }
  0xc1   :  { %v169_v5 = vadd.f32 0.112945676, %v168_v1  ;;  %v158_v10 = vadd.f32 0.05243302, %v157_v4  ;;  %v121_v17 = vmul.f32 %v120_v13, %v411_v34 }
  0xc2   :  { %v132_v6 = vmul.f32 %v131_v3, %v411_v34 }
  0xc3   :  { %v170_v7 = vmul.f32 %v169_v5, %v152_v46  ;;  %v159_v14 = vmul.f32 %v158_v10, %v152_v46  ;;  %v122_v21 = vadd.f32 1.1283791, %v121_v17 }
  0xc4   :  { %v133_v9 = vadd.f32 1.0, %v132_v6 }
  0xc5   :  { %v171_v11 = vadd.f32 0.4994258, %v170_v7  ;;  %v160_v18 = vadd.f32 0.18741608, %v159_v14  ;;  %v123_v31 = vmul.f32 %v122_v21, %v407_v28 }
  0xc6   :  { %299 = vrcp.f32 %v133_v9  ;;  %v145_v22 = vand.u32 2147483648, %v133_v9  ;;  %v143_v27 = vand.u32 2147483647, %v133_v9  ;;  %vm139_vm1 = vweird.f32 %v133_v9 }
  0xc7   :  { %v172_v12 = vmul.f32 %v171_v11, %v152_v46  ;;  %v161_v24 = vmul.f32 %v160_v18, %v152_v46 }
  0xc8   :  { %v146_v32 = vor.u32 1.1754944e-38, %v145_v22  ;;  %vm144_vm3 = vcmp.eq.f32.partialorder %v143_v27, 8.507059e+37 }
  0xc9   :  { %v173_v15 = vadd.f32 1.0, %v172_v12  ;;  %v162_v36 = vadd.f32 1.1283791, %v161_v24 }
  0xcb   :  { %301 = vrcp.f32 %v173_v15  ;;  %v185_v37 = vand.u32 2147483648, %v173_v15  ;;  %v183_v41 = vand.u32 2147483647, %v173_v15  ;;  %vm179_vm5 = vweird.f32 %v173_v15 }
  0xcc   :  { %v300_v16 = vpop.eup %299  ;;  %v163_v46 = vmul.f32 %v162_v36, %v417_v38 }
  0xcd   :  { %v135_v19 = vmul.f32 %v300_v16, %v133_v9  ;;  %vm140_vm0 = vweird.f32 %v300_v16  ;;  %v186_v45 = vor.u32 1.1754944e-38, %v185_v37  ;;  %vm184_vm7 = vcmp.eq.f32.partialorder %v183_v41, 8.507059e+37 }
  0xce   :  { %vm141_vm2 = vmor %vm139_vm1, %vm140_vm0 }
  0xcf   :  { %v136_v20 = vsub.f32 1.0, %v135_v19 }
  0xd1   :  { %v302_v23 = vpop.eup %301  ;;  %v137_v25 = vmul.f32 %v300_v16, %v136_v20 }
  0xd2   :  { %v175_v29 = vmul.f32 %v302_v23, %v173_v15  ;;  %vm180_vm4 = vweird.f32 %v302_v23 }
  0xd3   :  { %v138_v30 = vadd.f32 %v300_v16, %v137_v25  ;;  %vm181_vm6 = vmor %vm179_vm5, %vm180_vm4 }
  0xd4   :  { %v176_v33 = vsub.f32 1.0, %v175_v29 }
  0xd5   :  { %v142_v34 = vsel %vm141_vm2, %v300_v16, %v138_v30 }
  0xd6   :  { %v147_v39 = vsel %vm144_vm3, %v146_v32, %v142_v34  ;;  %v177_v40 = vmul.f32 %v302_v23, %v176_v33 }
  0xd7   :  { %v148_v42 = vmul.f32 %v147_v39, %v123_v31 }
  0xd8   :  { %v178_v43 = vadd.f32 %v302_v23, %v177_v40 }
  0xd9   :  { %v259_v44 = vclamps-f32 %v148_v42, 1.0 }
  0xda   :  { %v182_v28 = vsel %vm181_vm6, %v302_v23, %v178_v43 }
  0xdb   :  { %v191_v48 = vadd.f32 1.0, %v259_v44  ;;  %v187_v49 = vsel %vm184_vm7, %v186_v45, %v182_v28 }
  0xdc   :  { %v188_v50 = vmul.f32 %v187_v49, %v163_v46 }
  0xdd   :  { %v193_v51 = vmul.f32 %v191_v48, %v107_v47 }
  0xde   :  { %v260_v52 = vclamps-f32 %v188_v50, 1.0 }
  0xdf   :  { %227 = vmatmul.f32.vlgmr.msra.gmra.mxu1 %v193_v51 }
  0xe0   :  { %v192_v54 = vadd.f32 1.0, %v260_v52 }
  0xe2   :  { %v194_v55 = vmul.f32 %v192_v54, %v108_v53 }
  0xe4   :  { %230 = vmatmul.f32.vlgmr.msra.gmra.mxu3 %v194_v55 }
 0x15c   :  { %v228_v38 = vpop.f32.mrf.mxu1 }
 0x15d   :  { %v249_v57 = vadd.f32 %v298_v56, %v228_v38 }
 0x15f   :  { %251 = vst [vmem:[%s448_s5] sm:$0xff] %v249_v57 }
 0x167   :  { %v231_v26 = vpop.f32.mrf.mxu3 }
 0x168   :  { %v250_v58 = vadd.f32 %v298_v56, %v231_v26 }
 0x16a   :  { %252 = vst [vmem:[%s448_s5 + $0x8] sm:$0xff] %v250_v58 }
 0x16b   :  { %257 = vsyncpa [#allocation4], 1 }
 0x16c   :  { %258 = vsyncpa [#allocation6], 1 }

</bundles_post_ra>
